<compile_context>
chip_gen: v7x
topology: tpu7x:2x2x1
jax: 0.10.0
libtpu: 0.0.40
codegen_flags: <defaults>
</compile_context>

<pallas_src>
import numpy as np
import jax
import jax.numpy as jnp
from jax.experimental import pallas as pl
from jax.experimental.pallas import tpu as pltpu


WIN_SIZE = 9
SIGMA = 1.5
K1, K2 = 0.01, 0.03
COV_NORM = 1.0  # use_sample_covariance=False


# ----------------------------------------------------------------------------
# Host-side weight construction
# ----------------------------------------------------------------------------

def _gaussian_1d(win_size=WIN_SIZE, sigma=SIGMA):
    coords = np.arange(win_size, dtype=np.float32) - (win_size // 2)
    g = np.exp(-(coords ** 2) / (2.0 * sigma ** 2)).astype(np.float32)
    return g / g.sum()


def _round_up(x, m):
    return ((x + m - 1) // m) * m


def _banded_h(g, W, Wo, Wop):
    """(W, Wop): (img @ Gh)[r, c] = sum_j g[j]*img[r, c+j] for c < Wo; 0 for c >= Wo."""
    win = len(g)
    Gh = np.zeros((W, Wop), dtype=np.float32)
    for c in range(Wo):
        Gh[c:c + win, c] = g
    return Gh


def _banded_v(g, H, Ho, Hop):
    """(Hop, H): (Gv @ img)[r, c] = sum_i g[i]*img[r+i, c] for r < Ho; 0 for r >= Ho."""
    win = len(g)
    Gv = np.zeros((Hop, H), dtype=np.float32)
    for r in range(Ho):
        Gv[r, r:r + win] = g
    return Gv


# ----------------------------------------------------------------------------
# Footprint-aware block-batch picker
# ----------------------------------------------------------------------------

def _pick_block_batch(B, H, W, Hop, Wop, budget_bytes):
    """Images per grid step.  Keeps the real per-step VMEM working set under
    budget, keeps >= 2 grid steps when B >= 2 (v7x has 2 TensorCores), and
    caps the in-kernel static unroll."""

    def footprint(bt):
        slabs = 2 * 2 * bt * H * W * 4            # x, y input slabs, double-buffered
        horiz = 5 * bt * H * Wop * 4              # 5 horizontal intermediates
        vert = 10 * Hop * Wop * 4                 # per-image u*/v*/S temporaries
        weights = 2 * (W * Wop + Hop * H) * 4     # Gh, Gv (assume double-buffered)
        outs = 2 * 2 * 8 * 128 * 4
        return slabs + horiz + vert + weights + outs

    cands = [d for d in range(1, B + 1)
             if B % d == 0
             and d <= 8                                      # bound static unroll
             and (d == B or (d * H) % 8 == 0)                # (8,128) sublane rule
             and footprint(d) <= budget_bytes]
    if not cands:
        return B  # last resort: whole batch in one step (block == full extent)
    pref = [d for d in cands if B // d >= 2] or cands        # prefer G >= 2
    return max(pref)


# ----------------------------------------------------------------------------
# Kernel
# ----------------------------------------------------------------------------

def _make_ssim_kernel(H, Bt, C1, C2, cov_norm):
    C1 = float(C1)
    C2 = float(C2)
    cov_norm = float(cov_norm)

    def kernel(gh_ref, gv_ref, x_ref, y_ref, s_ref, l1_ref):
        gh = gh_ref[...]           # (W, Wop)   shared horizontal banded weight
        gv = gv_ref[...]           # (Hop, H)   shared vertical banded weight
        x = x_ref[...]             # (Bt*H, W)  batch folded into sublanes
        y = y_ref[...]

        # Horizontal 9-tap pass: one shared-weight MXU matmul per operand
        # (rows never straddle images, so no cross-image bleed is possible).
        hx = jnp.dot(x, gh, preferred_element_type=jnp.float32)        # (Bt*H, Wop)
        hy = jnp.dot(y, gh, preferred_element_type=jnp.float32)
        hxx = jnp.dot(x * x, gh, preferred_element_type=jnp.float32)
        hyy = jnp.dot(y * y, gh, preferred_element_type=jnp.float32)
        hxy = jnp.dot(x * y, gh, preferred_element_type=jnp.float32)

        s_acc = jnp.zeros((1, 1), jnp.float32)

        # Vertical pass per image (small static unroll) so the 9-tap window
        # never bleeds across image boundaries along sublanes.
        for b in range(Bt):
            r0 = b * H
            ux = jnp.dot(gv, hx[r0:r0 + H], preferred_element_type=jnp.float32)   # (Hop, Wop)
            uy = jnp.dot(gv, hy[r0:r0 + H], preferred_element_type=jnp.float32)
            uxx = jnp.dot(gv, hxx[r0:r0 + H], preferred_element_type=jnp.float32)
            uyy = jnp.dot(gv, hyy[r0:r0 + H], preferred_element_type=jnp.float32)
            uxy = jnp.dot(gv, hxy[r0:r0 + H], preferred_element_type=jnp.float32)

            vx = cov_norm * (uxx - ux * ux)
            vy = cov_norm * (uyy - uy * uy)
            vxy = cov_norm * (uxy - ux * uy)

            A1 = 2.0 * ux * uy + C1
            A2 = 2.0 * vxy + C2
            B1 = ux * ux + uy * uy + C1
            B2 = vx + vy + C2
            # Padded rows/cols have all u* == 0 -> S == 1 -> contribute 0 to sum(1-S).
            S = (A1 * A2) / (B1 * B2)
            s_acc = s_acc + jnp.sum(1.0 - S, keepdims=True)

        l1_acc = jnp.sum(jnp.abs(x - y), keepdims=True)                  # (1, 1)

        # One full unmasked lane-dense (8,128) store per output per grid step;
        # the wrapper reads element [i, 0, 0].
        s_ref[...] = jnp.broadcast_to(s_acc, s_ref.shape)
        l1_ref[...] = jnp.broadcast_to(l1_acc, l1_ref.shape)

    return kernel


# ----------------------------------------------------------------------------
# Wrapper
# ----------------------------------------------------------------------------

def ssim_mix(X, Y, alpha=0.5, beta=1.0, data_range=2.0):
    """Equivalent of SSIM().forward(X, Y) with default args
    (use_pad=False, return_full=False). X, Y: NCHW float32 with C == 1."""
    B, C, H, W = X.shape
    assert C == 1, "conv weight is (1,1,k,k); PyTorch conv2d requires C == 1"
    assert H >= WIN_SIZE and W >= WIN_SIZE, "image smaller than the SSIM window"

    C1 = (K1 * data_range) ** 2
    C2 = (K2 * data_range) ** 2
    Ho, Wo = H - WIN_SIZE + 1, W - WIN_SIZE + 1
    Hop = _round_up(Ho, 8)
    Wop = _round_up(Wo, 128)

    try:
        vmem_cap = int(pltpu.get_tpu_info().vmem_capacity_bytes)
    except Exception:
        vmem_cap = 64 * 1024 * 1024
    budget = min(vmem_cap // 3, 20 * 1024 * 1024)

    Bt = _pick_block_batch(B, H, W, Hop, Wop, budget)
    assert B % Bt == 0
    G = B // Bt

    g = _gaussian_1d()
    gh = jnp.asarray(_banded_h(g, W, Wo, Wop))     # (W, Wop)
    gv = jnp.asarray(_banded_v(g, H, Ho, Hop))     # (Hop, H)

    # Batch folded into sublanes: (B,1,H,W) -> (B*H, W) is a free reshape.
    x2 = X.reshape(B * H, W).astype(jnp.float32)
    y2 = Y.reshape(B * H, W).astype(jnp.float32)

    kernel = _make_ssim_kernel(H, Bt, C1, C2, COV_NORM)

    flops_per_block = (
        3 * Bt * H * W                       # x*x, y*y, x*y
        + 5 * 2 * Bt * H * W * Wop           # horizontal matmuls
        + 5 * Bt * 2 * Hop * H * Wop         # vertical matmuls
        + 25 * Bt * Hop * Wop                # SSIM elementwise
        + 3 * Bt * H * W                     # |x-y| + reductions
    )
    cost = pl.CostEstimate(
        flops=int(G * flops_per_block),
        transcendentals=int(B * Hop * Wop),  # per-pixel division
        bytes_accessed=int(4 * (2 * B * H * W + W * Wop + Hop * H + 2 * G * 8 * 128)),
    )

    vmem_limit = int(min(max(2 * budget, 32 * 1024 * 1024), 48 * 1024 * 1024))

    s_parts, l1_parts = pl.pallas_call(
        kernel,
        out_shape=(jax.ShapeDtypeStruct((G, 8, 128), jnp.float32),
                   jax.ShapeDtypeStruct((G, 8, 128), jnp.float32)),
        grid_spec=pltpu.PrefetchScalarGridSpec(
            num_scalar_prefetch=0,
            grid=(G,),
            in_specs=[
                pl.BlockSpec((W, Wop), lambda i: (0, 0)),        # Gh (resident)
                pl.BlockSpec((Hop, H), lambda i: (0, 0)),        # Gv (resident)
                pl.BlockSpec((Bt * H, W), lambda i: (i, 0)),     # x slab
                pl.BlockSpec((Bt * H, W), lambda i: (i, 0)),     # y slab
            ],
            out_specs=(
                pl.BlockSpec((1, 8, 128), lambda i: (i, 0, 0)),
                pl.BlockSpec((1, 8, 128), lambda i: (i, 0, 0)),
            ),
        ),
        compiler_params=pltpu.CompilerParams(
            dimension_semantics=("parallel",),
            vmem_limit_bytes=vmem_limit,
        ),
        cost_estimate=cost,
    )(gh, gv, x2, y2)

    s_sum = jnp.sum(s_parts[:, 0, 0])
    l1_sum = jnp.sum(l1_parts[:, 0, 0])
    ssim_loss = s_sum / (B * Ho * Wo)
    l1_loss = l1_sum / (B * H * W)
    return alpha * ssim_loss + beta * l1_loss


# ----------------------------------------------------------------------------
# Pure-numpy float64 reference (mirrors the PyTorch forward exactly)
# ----------------------------------------------------------------------------

def _reference_mix_np(X, Y, alpha=0.5, beta=1.0, data_range=2.0):
    Xn = np.asarray(X, dtype=np.float64)
    Yn = np.asarray(Y, dtype=np.float64)
    _, _, H, W = Xn.shape
    win = WIN_SIZE
    Ho, Wo = H - win + 1, W - win + 1
    coords = np.arange(win, dtype=np.float64) - win // 2
    g = np.exp(-coords ** 2 / (2.0 * SIGMA ** 2))
    g /= g.sum()
    C1 = (K1 * data_range) ** 2
    C2 = (K2 * data_range) ** 2

    def conv(a):  # valid separable cross-correlation, NCHW
        h = np.zeros(a.shape[:2] + (H, Wo), dtype=np.float64)
        for j in range(win):
            h += g[j] * a[..., :, j:j + Wo]
        v = np.zeros(a.shape[:2] + (Ho, Wo), dtype=np.float64)
        for i in range(win):
            v += g[i] * h[..., i:i + Ho, :]
        return v

    ux, uy = conv(Xn), conv(Yn)
    uxx, uyy, uxy = conv(Xn * Xn), conv(Yn * Yn), conv(Xn * Yn)
    vx = COV_NORM * (uxx - ux * ux)
    vy = COV_NORM * (uyy - uy * uy)
    vxy = COV_NORM * (uxy - ux * uy)
    A1, A2 = 2 * ux * uy + C1, 2 * vxy + C2
    B1, B2 = ux ** 2 + uy ** 2 + C1, vx + vy + C2
    S = A1 * A2 / (B1 * B2)
    ssim_loss = (1.0 - S).mean()
    l1 = np.abs(Xn - Yn).mean()
    return alpha * ssim_loss + beta * l1


if __name__ == "__main__":
    key = jax.random.PRNGKey(0)
    kx, ky = jax.random.split(key)
    B, C, H, W = 2, 1, 16, 16  # C must be 1 (conv weight is (1,1,9,9))
    X = jax.random.uniform(kx, (B, C, H, W), jnp.float32, minval=-1.0, maxval=1.0)
    Y = jax.random.uniform(ky, (B, C, H, W), jnp.float32, minval=-1.0, maxval=1.0)

    out = ssim_mix(X, Y)
    out = jax.block_until_ready(out)

    ref = _reference_mix_np(np.asarray(X), np.asarray(Y))
    np.testing.assert_allclose(np.asarray(out), ref, rtol=1e-4, atol=1e-4)

    print("KERNEL_OK")
</pallas_src>

<mosaic_0001>
module attributes {stable_mosaic.version = 11 : i64} {
  func.func @kernel(%arg0: i32, %arg1: memref<16x128xf32, #tpu.memory_space<vmem>>, %arg2: memref<8x16xf32, #tpu.memory_space<vmem>>, %arg3: memref<16x16xf32, #tpu.memory_space<vmem>>, %arg4: memref<16x16xf32, #tpu.memory_space<vmem>>, %arg5: memref<1x8x128xf32, #tpu.memory_space<vmem>>, %arg6: memref<1x8x128xf32, #tpu.memory_space<vmem>>) attributes {dimension_semantics = [#tpu.dimension_semantics<parallel>], iteration_bounds = array<i64: 2>, scalar_prefetch = 0 : i64, scratch_operands = 0 : i64, tpu.core_type = #tpu.core_type<tc>, window_params = [{pipeline_mode = #tpu.pipeline_mode<synchronous>, transform_indices = @transform_0, window_bounds = array<i64: 16, 128>}, {pipeline_mode = #tpu.pipeline_mode<synchronous>, transform_indices = @transform_1, window_bounds = array<i64: 8, 16>}, {transform_indices = @transform_2, window_bounds = array<i64: 16, 16>}, {transform_indices = @transform_3, window_bounds = array<i64: 16, 16>}, {transform_indices = @transform_4, window_bounds = array<i64: 1, 8, 128>}, {transform_indices = @transform_5, window_bounds = array<i64: 1, 8, 128>}]} {
    %c0 = arith.constant 0 : index
    %c0_0 = arith.constant 0 : index
    %0 = vector.load %arg1[%c0, %c0_0] : memref<16x128xf32, #tpu.memory_space<vmem>>, vector<16x128xf32>
    %c0_1 = arith.constant 0 : index
    %c0_2 = arith.constant 0 : index
    %1 = vector.load %arg2[%c0_1, %c0_2] : memref<8x16xf32, #tpu.memory_space<vmem>>, vector<8x16xf32>
    %c0_3 = arith.constant 0 : index
    %c0_4 = arith.constant 0 : index
    %2 = vector.load %arg3[%c0_3, %c0_4] : memref<16x16xf32, #tpu.memory_space<vmem>>, vector<16x16xf32>
    %c0_5 = arith.constant 0 : index
    %c0_6 = arith.constant 0 : index
    %3 = vector.load %arg4[%c0_5, %c0_6] : memref<16x16xf32, #tpu.memory_space<vmem>>, vector<16x16xf32>
    %cst = arith.constant dense<0.000000e+00> : vector<16x128xf32>
    %4 = tpu.matmul %2, %0, %cst {dimension_numbers = #tpu.dot_dimension_numbers<[1], [0], [0], [1], [0, 0, 1, 1], [], []>} : vector<16x16xf32>, vector<16x128xf32>, vector<16x128xf32> -> vector<16x128xf32>
    %cst_7 = arith.constant dense<0.000000e+00> : vector<16x128xf32>
    %5 = tpu.matmul %3, %0, %cst_7 {dimension_numbers = #tpu.dot_dimension_numbers<[1], [0], [0], [1], [0, 0, 1, 1], [], []>} : vector<16x16xf32>, vector<16x128xf32>, vector<16x128xf32> -> vector<16x128xf32>
    %6 = arith.mulf %2, %2 : vector<16x16xf32>
    %cst_8 = arith.constant dense<0.000000e+00> : vector<16x128xf32>
    %7 = tpu.matmul %6, %0, %cst_8 {dimension_numbers = #tpu.dot_dimension_numbers<[1], [0], [0], [1], [0, 0, 1, 1], [], []>} : vector<16x16xf32>, vector<16x128xf32>, vector<16x128xf32> -> vector<16x128xf32>
    %8 = arith.mulf %3, %3 : vector<16x16xf32>
    %cst_9 = arith.constant dense<0.000000e+00> : vector<16x128xf32>
    %9 = tpu.matmul %8, %0, %cst_9 {dimension_numbers = #tpu.dot_dimension_numbers<[1], [0], [0], [1], [0, 0, 1, 1], [], []>} : vector<16x16xf32>, vector<16x128xf32>, vector<16x128xf32> -> vector<16x128xf32>
    %10 = arith.mulf %2, %3 : vector<16x16xf32>
    %cst_10 = arith.constant dense<0.000000e+00> : vector<16x128xf32>
    %11 = tpu.matmul %10, %0, %cst_10 {dimension_numbers = #tpu.dot_dimension_numbers<[1], [0], [0], [1], [0, 0, 1, 1], [], []>} : vector<16x16xf32>, vector<16x128xf32>, vector<16x128xf32> -> vector<16x128xf32>
    %cst_11 = arith.constant 0.000000e+00 : f32
    %12 = vector.broadcast %cst_11 : f32 to vector<1x1xf32>
    %cst_12 = arith.constant dense<0.000000e+00> : vector<8x128xf32>
    %13 = tpu.matmul %1, %4, %cst_12 {dimension_numbers = #tpu.dot_dimension_numbers<[1], [0], [0], [1], [0, 0, 1, 1], [], []>} : vector<8x16xf32>, vector<16x128xf32>, vector<8x128xf32> -> vector<8x128xf32>
    %cst_13 = arith.constant dense<0.000000e+00> : vector<8x128xf32>
    %14 = tpu.matmul %1, %5, %cst_13 {dimension_numbers = #tpu.dot_dimension_numbers<[1], [0], [0], [1], [0, 0, 1, 1], [], []>} : vector<8x16xf32>, vector<16x128xf32>, vector<8x128xf32> -> vector<8x128xf32>
    %cst_14 = arith.constant dense<0.000000e+00> : vector<8x128xf32>
    %15 = tpu.matmul %1, %7, %cst_14 {dimension_numbers = #tpu.dot_dimension_numbers<[1], [0], [0], [1], [0, 0, 1, 1], [], []>} : vector<8x16xf32>, vector<16x128xf32>, vector<8x128xf32> -> vector<8x128xf32>
    %cst_15 = arith.constant dense<0.000000e+00> : vector<8x128xf32>
    %16 = tpu.matmul %1, %9, %cst_15 {dimension_numbers = #tpu.dot_dimension_numbers<[1], [0], [0], [1], [0, 0, 1, 1], [], []>} : vector<8x16xf32>, vector<16x128xf32>, vector<8x128xf32> -> vector<8x128xf32>
    %cst_16 = arith.constant dense<0.000000e+00> : vector<8x128xf32>
    %17 = tpu.matmul %1, %11, %cst_16 {dimension_numbers = #tpu.dot_dimension_numbers<[1], [0], [0], [1], [0, 0, 1, 1], [], []>} : vector<8x16xf32>, vector<16x128xf32>, vector<8x128xf32> -> vector<8x128xf32>
    %18 = arith.mulf %13, %13 : vector<8x128xf32>
    %19 = arith.subf %15, %18 : vector<8x128xf32>
    %cst_17 = arith.constant 1.000000e+00 : f32
    %20 = vector.broadcast %cst_17 : f32 to vector<8x128xf32>
    %21 = arith.mulf %20, %19 : vector<8x128xf32>
    %22 = arith.mulf %14, %14 : vector<8x128xf32>
    %23 = arith.subf %16, %22 : vector<8x128xf32>
    %cst_18 = arith.constant 1.000000e+00 : f32
    %24 = vector.broadcast %cst_18 : f32 to vector<8x128xf32>
    %25 = arith.mulf %24, %23 : vector<8x128xf32>
    %26 = arith.mulf %13, %14 : vector<8x128xf32>
    %27 = arith.subf %17, %26 : vector<8x128xf32>
    %cst_19 = arith.constant 1.000000e+00 : f32
    %28 = vector.broadcast %cst_19 : f32 to vector<8x128xf32>
    %29 = arith.mulf %28, %27 : vector<8x128xf32>
    %cst_20 = arith.constant 2.000000e+00 : f32
    %30 = vector.broadcast %cst_20 : f32 to vector<8x128xf32>
    %31 = arith.mulf %30, %13 : vector<8x128xf32>
    %32 = arith.mulf %31, %14 : vector<8x128xf32>
    %cst_21 = arith.constant 4.000000e-04 : f32
    %33 = vector.broadcast %cst_21 : f32 to vector<8x128xf32>
    %34 = arith.addf %32, %33 : vector<8x128xf32>
    %cst_22 = arith.constant 2.000000e+00 : f32
    %35 = vector.broadcast %cst_22 : f32 to vector<8x128xf32>
    %36 = arith.mulf %35, %29 : vector<8x128xf32>
    %cst_23 = arith.constant 3.600000e-03 : f32
    %37 = vector.broadcast %cst_23 : f32 to vector<8x128xf32>
    %38 = arith.addf %36, %37 : vector<8x128xf32>
    %39 = arith.mulf %13, %13 : vector<8x128xf32>
    %40 = arith.mulf %14, %14 : vector<8x128xf32>
    %41 = arith.addf %39, %40 : vector<8x128xf32>
    %cst_24 = arith.constant 4.000000e-04 : f32
    %42 = vector.broadcast %cst_24 : f32 to vector<8x128xf32>
    %43 = arith.addf %41, %42 : vector<8x128xf32>
    %44 = arith.addf %21, %25 : vector<8x128xf32>
    %cst_25 = arith.constant 3.600000e-03 : f32
    %45 = vector.broadcast %cst_25 : f32 to vector<8x128xf32>
    %46 = arith.addf %44, %45 : vector<8x128xf32>
    %47 = arith.mulf %34, %38 : vector<8x128xf32>
    %48 = arith.mulf %43, %46 : vector<8x128xf32>
    %49 = arith.divf %47, %48 : vector<8x128xf32>
    %cst_26 = arith.constant 1.000000e+00 : f32
    %50 = vector.broadcast %cst_26 : f32 to vector<8x128xf32>
    %51 = arith.subf %50, %49 : vector<8x128xf32>
    %52 = vector.shape_cast %51 : vector<8x128xf32> to vector<1x8x128xf32>
    %cst_27 = arith.constant dense<0.000000e+00> : vector<1xf32>
    %53 = vector.multi_reduction <add>, %52, %cst_27 [1, 2] : vector<1x8x128xf32> to vector<1xf32>
    %54 = vector.shape_cast %53 : vector<1xf32> to vector<1x1x1xf32>
    %55 = vector.extract %54[0, 0, 0] : f32 from vector<1x1x1xf32>
    %56 = vector.broadcast %55 : f32 to vector<1x1xf32>
    %57 = arith.addf %12, %56 : vector<1x1xf32>
    %58 = arith.subf %2, %3 : vector<16x16xf32>
    %59 = math.absf %58 : vector<16x16xf32>
    %60 = vector.shape_cast %59 : vector<16x16xf32> to vector<1x16x16xf32>
    %cst_28 = arith.constant dense<0.000000e+00> : vector<1xf32>
    %61 = vector.multi_reduction <add>, %60, %cst_28 [1, 2] : vector<1x16x16xf32> to vector<1xf32>
    %62 = vector.shape_cast %61 : vector<1xf32> to vector<1x1x1xf32>
    %63 = vector.extract %62[0, 0, 0] : f32 from vector<1x1x1xf32>
    %64 = vector.broadcast %63 : f32 to vector<1x1xf32>
    %65 = vector.shape_cast %57 : vector<1x1xf32> to vector<1x1x1xf32>
    %66 = vector.broadcast %65 : vector<1x1x1xf32> to vector<1x8x128xf32>
    %c0_29 = arith.constant 0 : index
    %c0_30 = arith.constant 0 : index
    %c0_31 = arith.constant 0 : index
    %67 = vector.load %arg5[%c0_29, %c0_30, %c0_31] : memref<1x8x128xf32, #tpu.memory_space<vmem>>, vector<1x8x128xf32>
    tpu.vector_store %arg5[%c0_29, %c0_30, %c0_31], %66 {strides = array<i32>} : memref<1x8x128xf32, #tpu.memory_space<vmem>>, vector<1x8x128xf32>,
    %68 = vector.shape_cast %64 : vector<1x1xf32> to vector<1x1x1xf32>
    %69 = vector.broadcast %68 : vector<1x1x1xf32> to vector<1x8x128xf32>
    %c0_32 = arith.constant 0 : index
    %c0_33 = arith.constant 0 : index
    %c0_34 = arith.constant 0 : index
    %70 = vector.load %arg6[%c0_32, %c0_33, %c0_34] : memref<1x8x128xf32, #tpu.memory_space<vmem>>, vector<1x8x128xf32>
    tpu.vector_store %arg6[%c0_32, %c0_33, %c0_34], %69 {strides = array<i32>} : memref<1x8x128xf32, #tpu.memory_space<vmem>>, vector<1x8x128xf32>,
    return
  }
  func.func @transform_0(%arg0: i32) -> (i32, i32) {
    %c0_i32 = arith.constant 0 : i32
    %c0_i32_0 = arith.constant 0 : i32
    %c0_i32_1 = arith.constant 0 : i32
    return %c0_i32, %c0_i32_0 : i32, i32
  }
  func.func @transform_1(%arg0: i32) -> (i32, i32) {
    %c0_i32 = arith.constant 0 : i32
    %c0_i32_0 = arith.constant 0 : i32
    %c0_i32_1 = arith.constant 0 : i32
    return %c0_i32, %c0_i32_0 : i32, i32
  }
  func.func @transform_2(%arg0: i32) -> (i32, i32) {
    %c0_i32 = arith.constant 0 : i32
    %c0_i32_0 = arith.constant 0 : i32
    return %arg0, %c0_i32 : i32, i32
  }
  func.func @transform_3(%arg0: i32) -> (i32, i32) {
    %c0_i32 = arith.constant 0 : i32
    %c0_i32_0 = arith.constant 0 : i32
    return %arg0, %c0_i32 : i32, i32
  }
  func.func @transform_4(%arg0: i32) -> (i32, i32, i32) {
    %c0_i32 = arith.constant 0 : i32
    %c0_i32_0 = arith.constant 0 : i32
    %c0_i32_1 = arith.constant 0 : i32
    return %arg0, %c0_i32, %c0_i32_0 : i32, i32, i32
  }
  func.func @transform_5(%arg0: i32) -> (i32, i32, i32) {
    %c0_i32 = arith.constant 0 : i32
    %c0_i32_0 = arith.constant 0 : i32
    %c0_i32_1 = arith.constant 0 : i32
    return %arg0, %c0_i32, %c0_i32_0 : i32, i32, i32
  }
}

</mosaic_0001>

<bundles_post_ra>
// kernel: tpu_custom_call.1
= control target key start
LH: loop header
LB: loop body
LE: loop exit
PB: predicated region body
PF: predicated region fallthrough
CT: control target
= control target key end

     0   :  { %11 = vsyncpa [#allocation3], 0  ;;  %s1772_s0 = inlined_call_operand.vmem [shape: f32[16,128], index: 0, kind: input, shape index: {}]   ;;  %s1773_s1 = inlined_call_operand.vmem [shape: f32[8,16], index: 1, kind: input, shape index: {}]   ;;  %s1774_s2 = inlined_call_operand.vmem [shape: f32[32,16], index: 2, kind: input, shape index: {}]   ;;  %s1775_s3 = inlined_call_operand.vmem [shape: f32[32,16], index: 3, kind: input, shape index: {}]   ;;  %s1776_s4 = inlined_call_operand.hbm [shape: f32[2,8,128], index: 4, kind: output, shape index: {0}]   ;;  %s1777_s5 = inlined_call_operand.hbm [shape: f32[2,8,128], index: 5, kind: output, shape index: {1}]  }
   0x1   :  { %13 = vsyncpa [#allocation3 + $0x1], 0 }
   0x2   :  { %14 = vsyncpa [#allocation5], 0 }
   0x3   :  { %16 = vsyncpa [#allocation5 + $0x1], 0  ;;  %s1570_s18 = smov 0   ;;  %s1572_s19 = smov 0  }
   0x4   :  { %s1574_s20 = smov 0   ;;  %s1576_s21 = smov 0  }
   0x5 LB: > { %s1591_s22 = sadd.s32 4294967295, %s1533_s21   ;;  %s1215_s23 = sadd.s32 4294967294, %s1533_s21   ;;  %s1533_s21 = sphi %s1576_s21, %s1783_s21   ;;  %s1529_s20 = sphi %s1574_s20, %s1782_s20   ;;  %s1525_s19 = sphi %s1572_s19, %s1781_s19   ;;  %s1521_s18 = sphi %s1570_s18, %s1780_s18  }
   0x6   : > { %s1595_s24 = sadd.s32 1, %s1533_s21   ;;  %s123_s25 = sadd.s32 1, %s1529_s20 }
   0x7   : > { %s120_s26 = ssub.s32 %s1533_s21, %s1595_s24  ;;  %p133_p0 = scmp.ne.s32.totalorder %s1529_s20, %s1525_s19 }
   0x8   : > { %p121_p1 = scmp.eq.s32.totalorder %s120_s26, 0  ;;  %p134_p2 = scmp.eq.s32.totalorder %s1591_s22, 1 }
   0x9   : > { %p139_p3 = scmp.ne.s32.totalorder %s1525_s19, %s1521_s18  ;;  %p140_p4 = scmp.eq.s32.totalorder %s1215_s23, 1 }
   0xa   : > { %s1606_s27 = scalar_select %p121_p1, %s1529_s20, %s123_s25  }
   0xb   : > { %p1608_p5 = por %p134_p2, %p133_p0  ;;  %p1612_p6 = por %p140_p4, %p139_p3 }
   0xc   : > { %p1218_p7 = scmp.ge.s32.totalorder %s1533_s21, 1  ;;  %p208_p8 = scmp.lt.s32.totalorder %s1533_s21, 3 }
   0xe   : > { %p209_p9 = pnand %p1218_p7, %p208_p8 }
   0xf   : > { %v258_v0 = vld [vmem:[%s1772_s0] sm:$0xff] (!%p209_p9)  ;;  %v259_v1 = vld [vmem:[%s1772_s0 + $0x8] sm:$0xff] (!%p209_p9)  ;;  %s1221_s9 = sshll.u32 (!%p209_p9), %s1591_s22, 1  ;;  %vm265_vm0 = vcmask (!%p209_p9), 130048   ;;  %v1535_v13 = vmov (!%p209_p9), 0.0|0.0   ;;  %vm1536_vm1 = vmmov (!%p209_p9), 0  }
  0x10   : > { %212 = sbr.rel (%p209_p9) target bundleno = 729 (0x2d9), region = 36  ;;  %v1351_v2 = vpack.c.bf16 (!%p209_p9), %v259_v1, %v258_v0  ;;  %p247_p10 = scmp.lt.s32.totalorder (!%p209_p9), %s1221_s9, 3  ;;  %v1537_v14 = vmov (!%p209_p9), 0.0   ;;  %v260_v23 = vld [vmem:[%s1773_s1] sm:$0xff] (!%p209_p9) }
  0x11   : > { %s1685_s25 = sand.u32 (!%p209_p9), 1, %s1525_s19   ;;  %s1242_s30 = sshll.u32 (!%p209_p9), %s1591_s22, 7 }
  0x12   : > { %1352 = vmatprep.subr.bf16.mxu0 (!%p209_p9), %v1351_v2  ;;  %1356 = vmatprep.subr.bf16.mxu1 (!%p209_p9), %v1351_v2  ;;  %s1219_s26 = sshll.u32 (!%p209_p9), %s1685_s25, 3  ;;  %s1697_s12 = scalar_lea.hbm (!%p209_p9), %s1776_s4, %s1242_s30 }
  0x13   : > { %1354 = vmatpush3.bf16.msra.mxu0 (!%p209_p9), %v1351_v2  ;;  %1358 = vmatpush3.bf16.msra.mxu1 (!%p209_p9), %v1351_v2  ;;  %s238_s6 = scalar_lea.vmem (!%p209_p9), [#allocation2], %s1219_s26  ;;  %s1689_s8 = scalar_lea.vmem (!%p209_p9), [#allocation4], %s1219_s26 }
  0x14   : > { %1360 = vmatprep.subr.bf16.mxu0 (!%p209_p9), %v1351_v2  ;;  %1364 = vmatprep.subr.bf16.mxu1 (!%p209_p9), %v1351_v2  ;;  %s1099_s7 = sshll.u32 (!%p209_p9), %s238_s6, 4  ;;  %s1081_s14 = scalar_lea.sflag (!%p209_p9), [#allocation3], %s1685_s25  ;;  %s1699_s7 = int_to_ptr.vmem [resolvable:$true] %s1099_s7 }
  0x15   : > { %s1439_s15 = scalar_lea.vmem (!%p209_p9), %s1699_s7, 128 }
  0x16   : > { %p1440_p11 = scmp.ne.s32.totalorder (!%p209_p9), %s1699_s7, %s1439_s15 }
  0x17   : > { %s1785_s9 = smov (!%p247_p10, %s1221_s9), 3 }
  0x18   : > { %s1222_s10 = sshll.u32 %s1785_s9, 3  ;;  %s1112_s9 = sshll.u32 %s1689_s8, 4  ;;  %s1701_s9 = int_to_ptr.vmem [resolvable:$true] %s1112_s9 }
  0x19   : > { %s250_s13 = scalar_lea.vmem %s1774_s2, %s1222_s10  ;;  %s256_s16 = scalar_lea.vmem %s1775_s3, %s1222_s10 }
  0x1a   : > { %v1631_v3 = vld [vmem:[%s250_s13] sm:$0xff]  ;;  %v1635_v5 = vld [vmem:[%s250_s13 + $0x8] sm:$0xff]  ;;  %p1441_p12 = pnand %p1440_p11, %p1608_p5 }
  0x1b   : > { %v1633_v4 = vld [vmem:[%s256_s16] sm:$0xff]  ;;  %1285 = vmatprep.mubr.msk.f32.mxu0 %vm265_vm0, %v1631_v3  ;;  %v1641_v6 = vld [vmem:[%s256_s16 + $0x8] sm:$0xff]  ;;  %v428_v7 = vmul.f32 %v1631_v3, %v1631_v3  ;;  %v429_v9 = vmul.f32 %v1635_v5, %v1635_v5  ;;  %s1538_s16 = smov [#allocation2]  }
  0x1c   : > { %1292 = vmatprep.mubr.msk.f32.mxu1 %vm265_vm0, %v1633_v4  ;;  %v511_v8 = vmul.f32 %v1633_v4, %v1633_v4  ;;  %1286 = vmatmul.mubr.msk.f32.vlgmr.msra.gmra.mrb[0].mxu0 %vm265_vm0, %v1635_v5  ;;  %v512_v10 = vmul.f32 %v1641_v6, %v1641_v6  ;;  %v594_v11 = vmul.f32 %v1633_v4, %v1631_v3  ;;  %p1442_p13 = pneg %p1441_p12  ;;  %s1443_s17 = sshll.u32 %s1538_s16, 4  ;;  %s1444_s17 = int_to_ptr.vmem [resolvable:$false] %s1443_s17 }
  0x1d   : > { %1293 = vmatmul.mubr.msk.f32.vlgmr.msra.gmra.mrb[0].mxu1 %vm265_vm0, %v1641_v6  ;;  %1362 = vmatpush3.bf16.msra.mxu0 %v1351_v2  ;;  %v595_v12 = vmul.f32 %v1641_v6, %v1635_v5  ;;  %v1061_v58 = vsub.f32 %v1631_v3, %v1633_v4  ;;  %v1062_v59 = vsub.f32 %v1635_v5, %v1641_v6  ;;  %s1445_s23 = scalar_lea.vmem %s1444_s17, 256  ;;  %p1446_p0 = scmp.lt.s32.totalorder %s1699_s7, %s1444_s17 }
  0x1e   : > { %1366 = vmatpush3.bf16.msra.mxu1 %v1351_v2  ;;  %1299 = vmatprep.mubr.msk.f32.mxu0 %vm265_vm0, %v428_v7  ;;  %p1447_p1 = scmp.lt.s32.totalorder %s1445_s23, %s1439_s15 }
  0x1f   : > { %1306 = vmatprep.mubr.msk.f32.mxu1 %vm265_vm0, %v511_v8  ;;  %1368 = vmatprep.subr.bf16.mxu0 %v1351_v2  ;;  %v1063_v60 = vand.u32 2147483647, %v1061_v58  ;;  %v1064_v61 = vand.u32 2147483647, %v1062_v59 }
  0x20   : > { %1300 = vmatmul.mubr.msk.f32.vlgmr.msra.gmra.mrb[2].mxu0 %vm265_vm0, %v429_v9  ;;  %1371 = vmatprep.subr.bf16.mxu1 %v1535_v13  ;;  %p1448_p2 = por %p1447_p1, %p1446_p0 }
  0x21   : > { %1307 = vmatmul.mubr.msk.f32.vlgmr.msra.gmra.mrb[2].mxu1 %vm265_vm0, %v512_v10  ;;  %1370 = vmatpush3.bf16.msra.mxu0 %v1351_v2  ;;  %v1065_v0 = vsel %vm265_vm0, %v1063_v60, 0.0  ;;  %v1066_v1 = vsel %vm265_vm0, %v1064_v61, 0.0 }
  0x22   : > { %1313 = vmatprep.mubr.msk.f32.mxu0 %vm265_vm0, %v594_v11  ;;  %1374 = vmatprep.subr.bf16.mxu0 %v1535_v13  ;;  %v1067_v7 = vadd.f32 %v1066_v1, %v1065_v0  ;;  %p1449_p3 = pnand %p1448_p2, %p1442_p13 }
  0x23   : > { %1320 = vmatprep.mubr.msk.f32.mxu1 %vm1536_vm1, %v1537_v14 }
  0x24   : > { %1314 = vmatmul.mubr.msk.f32.vlgmr.msra.gmra.mrb[4].mxu0 %vm265_vm0, %v595_v12 }
  0x25   : > { %1327 = vmatprep.mubr.msk.f32.mxu0 %vm1536_vm1, %v1537_v14 }
  0xef   : > { %v1287_v15 = vpop.f32.mrb[0].mxu0 }
  0xf0   : > { %v1294_v16 = vpop.f32.mrb[0].mxu1  ;;  %v338_v17 = vpop.f32.mrb[1].mxu0 }
  0xf1   : > { %v419_v18 = vpop.f32.mrb[1].mxu1  ;;  %v1372_v19 = vpack.c.bf16 %v1287_v15, %v338_v17 }
  0xf2   : > { %v1375_v20 = vpack.c.bf16 %v1294_v16, %v419_v18 }
  0xf3   : > { %v1301_v21 = vpop.f32.mrb[2].mxu0  ;;  %1373 = vmatpush3.bf16.msra.mxu1 %v1372_v19 }
  0xf4   : > { %v1308_v22 = vpop.f32.mrb[2].mxu1  ;;  %1376 = vmatpush3.bf16.msra.mxu0 %v1375_v20  ;;  %v502_v24 = vpop.f32.mrb[3].mxu0  ;;  %1377 = vmatprep.subr.bf16.mxu1 %v1535_v13 }
  0xf5   : > { %v585_v25 = vpop.f32.mrb[3].mxu1  ;;  %1380 = vmatprep.subr.bf16.mxu0 %v1535_v13  ;;  %v1378_v26 = vpack.c.bf16 %v1301_v21, %v502_v24 }
  0xf6   : > { %v1381_v27 = vpack.c.bf16 %v1308_v22, %v585_v25  ;;  %1321 = vmatmul.mubr.msk.f32.vlgmr.msra.gmra.mrb[4].mxu1 %vm265_vm0, %v260_v23 }
  0xf7   : > { %1328 = vmatmul.mubr.msk.f32.vlgmr.msra.gmra.mrb[6].mxu0 %vm265_vm0, %v260_v23  ;;  %v1315_v28 = vpop.f32.mrb[4].mxu0  ;;  %1379 = vmatpush3.bf16.msra.mxu1 %v1378_v26 }
  0xf8   : > { %1382 = vmatpush3.bf16.msra.mxu0 %v1381_v27  ;;  %v668_v29 = vpop.f32.mrb[5].mxu0  ;;  %1334 = vmatprep.mubr.msk.f32.mxu1 %vm1536_vm1, %v1537_v14 }
  0xf9   : > { %1341 = vmatprep.mubr.msk.f32.mxu0 %vm1536_vm1, %v1537_v14  ;;  %v1384_v30 = vpack.c.bf16 %v1315_v28, %v668_v29  ;;  %1383 = vmatprep.subr.bf16.mxu1 %v1535_v13 }
  0xfa   : > { %1335 = vmatmul.mubr.msk.f32.vlgmr.msra.gmra.mrb[6].mxu1 %vm265_vm0, %v260_v23 }
  0xfb   : > { %1342 = vmatmul.mubr.msk.f32.vlgmr.msra.gmra.mrb[8].mxu0 %vm265_vm0, %v260_v23  ;;  %1385 = vmatpush3.bf16.msra.mxu1 %v1384_v30 }
  0xfc   : > { %1348 = vmatprep.mubr.msk.f32.mxu1 %vm1536_vm1, %v1537_v14 }
  0xfe   : > { %1349 = vmatmul.mubr.msk.f32.vlgmr.msra.gmra.mrb[8].mxu1 %vm265_vm0, %v260_v23 }
 0x1c9   : > { %v746_v31 = vpop.f32.mrb[4].mxu1 }
 0x1ca   : > { %v816_v32 = vpop.f32.mrb[6].mxu0  ;;  %v1036_v33 = vmul.f32 2.0, %v746_v31  ;;  %v1322_v34 = vpop.f32.mrb[5].mxu1  ;;  %v1030_v36 = vmul.f32 %v746_v31, %v746_v31 }
 0x1cb   : > { %v1329_v35 = vpop.f32.mrb[7].mxu0  ;;  %v1032_v37 = vmul.f32 %v816_v32, %v816_v32  ;;  %v1034_v38 = vmul.f32 %v816_v32, %v746_v31 }
 0x1cc   : > { %v1037_v39 = vmul.f32 %v1036_v33, %v816_v32 }
 0x1cd   : > { %v1041_v40 = vadd.f32 %v1032_v37, %v1030_v36  ;;  %v886_v41 = vpop.f32.mrb[6].mxu1 }
 0x1ce   : > { %v956_v42 = vpop.f32.mrb[8].mxu0  ;;  %v1031_v43 = vsub.f32 %v886_v41, %v1030_v36  ;;  %v1336_v45 = vpop.f32.mrb[7].mxu1  ;;  %v1038_v55 = vadd.f32 0.0004, %v1037_v39 }
 0x1cf   : > { %v1033_v44 = vsub.f32 %v956_v42, %v1032_v37  ;;  %v1343_v46 = vpop.f32.mrb[9].mxu0  ;;  %v1042_v49 = vadd.f32 0.0004, %v1041_v40 }
 0x1d1   : > { %v1043_v47 = vadd.f32 %v1033_v44, %v1031_v43  ;;  %v1026_v48 = vpop.f32.mrb[8].mxu1 }
 0x1d2   : > { %v1035_v51 = vsub.f32 %v1026_v48, %v1034_v38  ;;  %v1350_v52 = vpop.f32.mrb[9].mxu1 }
 0x1d3   : > { %v1044_v50 = vadd.f32 0.0036, %v1043_v47 }
 0x1d4   : > { %v1039_v54 = vmul.f32 2.0, %v1035_v51 }
 0x1d5   : > { %v1046_v53 = vmul.f32 %v1044_v50, %v1042_v49 }
 0x1d6   : > { %v1040_v56 = vadd.f32 0.0036, %v1039_v54 }
 0x1d7   : > { %1437 = vrcp.f32 %v1046_v53 }
 0x1d8   : > { %v1045_v57 = vmul.f32 %v1040_v56, %v1038_v55 }
 0x1e1   : > { %v1438_v62 = vpop.eup %1437 }
 0x1e2   : > { %v1048_v63 = vmul.f32 %v1438_v62, %v1045_v57 }
 0x1e4   : > { %v1049_v2 = vsub.f32 1.0, %v1048_v63 }
 0x1e6   : > { %1050 = vadd.xlane.f32.xlu0 %v1049_v2 }
 0x1ea   : > { %1068 = vadd.xlane.f32.xlu0 %v1067_v7 }
 0x273   : > { %v1051_v8 = vpop.xlane.xlu0 %1050 }
 0x274   : > { %v1052_v9 = vrot.slane %v1051_v8, 4 }
 0x276   : > { %v1053_v10 = vadd.f32 %v1052_v9, %v1051_v8 }
 0x277   : > { %v1069_v3 = vpop.xlane.xlu0 %1068 }
 0x278   : > { %v1054_v4 = vrot.slane %v1053_v10, 2  ;;  %v1070_v5 = vrot.slane %v1069_v3, 4 }
 0x27a   : > { %v1071_v6 = vadd.f32 %v1070_v5, %v1069_v3  ;;  %v1055_v11 = vadd.f32 %v1054_v4, %v1053_v10 }
 0x27c   : > { %v1072_v12 = vrot.slane %v1071_v6, 2  ;;  %v1056_v13 = vrot.slane %v1055_v11, 1 }
 0x27e   : > { %v1073_v14 = vadd.f32 %v1072_v12, %v1071_v6  ;;  %v1057_v15 = vadd.f32 %v1056_v13, %v1055_v11 }
 0x280   : > { %1386 = vpush %v1057_v15  ;;  %v1074_v16 = vrot.slane %v1073_v14, 1 }
 0x282   : > { %v1075_v17 = vadd.f32 %v1074_v16, %v1073_v14 }
 0x284   : > { %1388 = vpush %v1075_v17 }
 0x2b1   : > { %s1387_s13 = spop %1386 }
 0x2b2   : > { %v1059_v18 = vstv %s1387_s13 }
 0x2b3   : > { %1077 = vst [vmem:[%s238_s6] sm:$0xff] %v1059_v18 }
 0x2b4   : > { %1452 = shalt.err (!%p1449_p3)
}
 0x2b5   : > { %s1453_s26 = scalar_lea.hbm %s1697_s12, 128  ;;  %s1457_s11 = scalar_lea.hbm %s1776_s4, 256 }
 0x2b6   : > { %p1454_p4 = scmp.ne.s32.totalorder %s1697_s12, %s1453_s26  ;;  %p1458_p9 = scmp.lt.u32.totalorder %s1697_s12, %s1776_s4 }
 0x2b7   : > { %p1459_p10 = scmp.lt.u32.totalorder %s1457_s11, %s1453_s26  ;;  %p1461_p12 = scmp.lt.u32.totalorder %s1453_s26, %s1697_s12 }
 0x2b8   : > { %p1455_p7 = pnand %p1454_p4, %p1608_p5 }
 0x2b9   : > { %p1460_p11 = por %p1459_p10, %p1458_p9 }
 0x2ba   : > { %p1456_p8 = pneg %p1455_p7 }
 0x2bb   : > { %p1462_p13 = por %p1461_p12, %p1460_p11 }
 0x2bd   : > { %p1463_p0 = pnand %p1462_p13, %p1456_p8 }
 0x2bf   : > { %1466 = shalt.err (!%p1463_p0)
}
 0x2c0   : > { %1390 = dma.vmem_to_hbm [thread:$0]  (%p1608_p5), %s1699_s7, 128, %s1697_s12, %s1081_s14  }
 0x2c1   : > { %s1389_s15 = spop %1388  ;;  %s1730_s26 = scalar_lea.hbm %s1777_s5, %s1242_s30 }
 0x2c2   : > { %v1078_v19 = vstv %s1389_s15  ;;  %s1086_s6 = scalar_lea.sflag [#allocation5], %s1685_s25  ;;  %s1467_s10 = scalar_lea.vmem %s1701_s9, 128 }
 0x2c3   : > { %1079 = vst [vmem:[%s1689_s8] sm:$0xff] %v1078_v19  ;;  %p1468_p1 = scmp.ne.s32.totalorder %s1701_s9, %s1467_s10  ;;  %s1539_s11 = smov [#allocation4]  }
 0x2c4   : > { %s1471_s13 = sshll.u32 %s1539_s11, 4  ;;  %s1472_s13 = int_to_ptr.vmem [resolvable:$false] %s1471_s13 }
 0x2c5   : > { %p1469_p2 = pnand %p1468_p1, %p1608_p5  ;;  %s1473_s16 = scalar_lea.vmem %s1472_s13, 256 }
 0x2c6   : > { %p1474_p4 = scmp.lt.s32.totalorder %s1701_s9, %s1472_s13  ;;  %p1475_p7 = scmp.lt.s32.totalorder %s1473_s16, %s1467_s10 }
 0x2c7   : > { %p1470_p3 = pneg %p1469_p2 }
 0x2c8   : > { %p1476_p8 = por %p1475_p7, %p1474_p4 }
 0x2ca   : > { %p1477_p9 = pnand %p1476_p8, %p1470_p3 }
 0x2cc   : > { %1480 = shalt.err (!%p1477_p9)
}
 0x2cd   : > { %s1481_s22 = scalar_lea.hbm %s1730_s26, 128  ;;  %s1485_s7 = scalar_lea.hbm %s1777_s5, 256 }
 0x2ce   : > { %p1482_p10 = scmp.ne.s32.totalorder %s1730_s26, %s1481_s22  ;;  %p1486_p13 = scmp.lt.u32.totalorder %s1730_s26, %s1777_s5 }
 0x2cf   : > { %p1487_p0 = scmp.lt.u32.totalorder %s1485_s7, %s1481_s22  ;;  %p1489_p2 = scmp.lt.u32.totalorder %s1481_s22, %s1730_s26 }
 0x2d0   : > { %p1483_p11 = pnand %p1482_p10, %p1608_p5 }
 0x2d1   : > { %p1488_p1 = por %p1487_p0, %p1486_p13 }
 0x2d2   : > { %p1484_p12 = pneg %p1483_p11 }
 0x2d3   : > { %p1490_p3 = por %p1489_p2, %p1488_p1 }
 0x2d5   : > { %p1491_p4 = pnand %p1490_p3, %p1484_p12 }
 0x2d7   : > { %1494 = shalt.err (!%p1491_p4)
}
 0x2d8   : > { %1391 = dma.vmem_to_hbm [thread:$0]  (%p1608_p5), %s1701_s9, 128, %s1730_s26, %s1086_s6  }
 0x2d9 PF: > { %p1401_p7 = scmp.ge.s32.totalorder %s1533_s21, 2  ;;  %s1124_s14 = sand.u32 1, %s1521_s18  }
 0x2da   : > { %s1125_s15 = scalar_lea.sflag [#allocation3], %s1124_s14 }
 0x2db   : > { %p1395_p8 = pnand %p1401_p7, %p1612_p6 }
 0x2dd   : > { %1512 = dma.done.wait (!%p1395_p8), %s1125_s15, 128  }
 0x2de   : > { %1514 = vsyncadd (!%p1395_p8), %s1125_s15, 4294967168  ;;  %s1134_s17 = scalar_lea.sflag [#allocation5], %s1124_s14 }
 0x2df   : > { %1516 = dma.done.wait (!%p1395_p8), %s1134_s17, 128  }
 0x2e0   : > { %1518 = vsyncadd (!%p1395_p8), %s1134_s17, 4294967168  ;;  %p19_p5 = scmp.ge.s32.totalorder %s1595_s24, 4   ;;  %s1780_s18 = smov %s1525_s19 }
 0x2e1   : > { %s1781_s19 = smov %s1529_s20  ;;  %s1782_s20 = smov %s1606_s27 }
 0x2e2   : > { %s1783_s21 = smov %s1595_s24  ;;  %21 = sbr.rel (!%p19_p5) target bundleno = 5 (0x5), region = 91 }
 0x2e9   :  { %1139 = vsyncpa [#allocation3], 1 }
 0x2ea   :  { %1141 = vsyncpa [#allocation3 + $0x1], 1 }
 0x2eb   :  { %1142 = vsyncpa [#allocation5], 1 }
 0x2ec   :  { %1144 = vsyncpa [#allocation5 + $0x1], 1 }

</bundles_post_ra>
